<compile_context>
chip_gen: v7x
topology: tpu7x:2x2x1
jax: 0.10.0
libtpu: 0.0.40
codegen_flags: <defaults>
</compile_context>

<pallas_src>
import functools

import jax
import jax.numpy as jnp
from jax import lax
from jax.experimental import pallas as pl
from jax.experimental.pallas import tpu as pltpu

_LANE = 128


def _fill_values(dtype):
    """Neutral fill values (for min / max) of the given dtype."""
    dtype = jnp.dtype(dtype)
    if jnp.issubdtype(dtype, jnp.floating):
        return jnp.array(-jnp.inf, dtype), jnp.array(jnp.inf, dtype)
    info = jnp.iinfo(dtype)
    return jnp.array(info.min, dtype), jnp.array(info.max, dtype)


@functools.lru_cache(maxsize=None)
def _hw_params():
    """(tk_cap, vmem_limit_bytes) tuned per TPU generation."""
    # Safe default everywhere: 2 MiB f32 tile at tr=128, 32 MiB scoped VMEM.
    tk_cap, vmem_limit = 4096, 32 * 1024 * 1024
    try:
        info = pltpu.get_tpu_info()
        vmem = int(getattr(info, "vmem_capacity_bytes", 0) or 0)
        if 0 < vmem <= 80 * 1024 * 1024:
            # v7x-class: 64 MiB physical VMEM, fastest HBM -> 4 MiB tiles
            # (8 MiB double-buffered), leave headroom below physical.
            tk_cap, vmem_limit = 8192, 48 * 1024 * 1024
        elif vmem > 80 * 1024 * 1024:
            # v5e / v6e: 128 MiB physical VMEM -> 8 MiB tiles are free.
            tk_cap, vmem_limit = 16384, 64 * 1024 * 1024
    except Exception:
        pass  # no TPU info available (e.g. interpret mode) -> keep defaults
    return tk_cap, vmem_limit


def _minmax_kernel(x_ref, min_ref, max_ref, min_acc, max_acc, *,
                   k_total, tk, ragged):
    """Row-wise min/max with lane-wide VMEM accumulators.

    Grid = (row_blocks, k_blocks); k (reduction axis) innermost.
      x_ref:   (tr, tk)   input tile
      min_ref: (tr, 1)    per-row min (resident across k, written at finalize)
      max_ref: (tr, 1)    per-row max
      min_acc: (tr, 128)  lane-wide running min (VMEM scratch)
      max_acc: (tr, 128)  lane-wide running max (VMEM scratch)
    """
    k = pl.program_id(1)
    nk = pl.num_programs(1)
    neg_fill, pos_fill = _fill_values(x_ref.dtype)
    tr = x_ref.shape[0]

    @pl.when(k == 0)
    def _():
        min_acc[...] = jnp.full(min_acc.shape, pos_fill, dtype=min_acc.dtype)
        max_acc[...] = jnp.full(max_acc.shape, neg_fill, dtype=max_acc.dtype)

    if tk % _LANE == 0:
        # VPU-only in-register fold of the tile's lane axis, one 128-lane
        # slice at a time, loaded directly from the ref (no whole-tile value).
        mn = None
        mx = None
        for c in range(tk // _LANE):
            xs = x_ref[:, c * _LANE:(c + 1) * _LANE]          # (tr, 128) vld
            if ragged:
                # Per-slice mask: only true out-of-range columns (global
                # column index k*tk + c*128 + lane >= k_total) neutralized.
                col = (lax.broadcasted_iota(jnp.int32, (tr, _LANE), 1)
                       + (k * tk + c * _LANE))
                valid = col < k_total
                xs_min = jnp.where(valid, xs, pos_fill)
                xs_max = jnp.where(valid, xs, neg_fill)
            else:
                xs_min = xs
                xs_max = xs
            mn = xs_min if mn is None else jnp.minimum(mn, xs_min)
            mx = xs_max if mx is None else jnp.maximum(mx, xs_max)
        # Single accumulator update per k tile (not per slice).
        min_acc[...] = jnp.minimum(min_acc[...], mn)
        max_acc[...] = jnp.maximum(max_acc[...], mx)
    else:
        # Tiny path: tk == K < 128 (single k block); one cross-lane reduce
        # into lane 0 of the accumulator.
        x = x_ref[...]
        min_acc[:, 0:1] = jnp.minimum(
            min_acc[:, 0:1], jnp.min(x, axis=1, keepdims=True))
        max_acc[:, 0:1] = jnp.maximum(
            max_acc[:, 0:1], jnp.max(x, axis=1, keepdims=True))

    @pl.when(k == nk - 1)
    def _():
        # Single XLU cross-lane reduce + narrow (tr, 1) store per row block.
        min_ref[...] = jnp.min(min_acc[...], axis=1, keepdims=True)
        max_ref[...] = jnp.max(max_acc[...], axis=1, keepdims=True)


def _rowwise_minmax(x2d, *, tr_cap=128):
    """Pallas call: per-row min & max of a (R, K) array -> two (R, 1) arrays."""
    R, K = x2d.shape
    dtype = x2d.dtype
    itemsize = jnp.dtype(dtype).itemsize
    tk_cap, vmem_limit = _hw_params()

    if K >= _LANE:
        # Lane-aligned K tile (multiple of 128), as large as the cap allows.
        tk = min(tk_cap, _LANE * (K // _LANE))
        ragged = (K % tk) != 0
    else:
        tk = K          # tiny input: whole (short) row, single k block
        ragged = False

    # Row tile: 128 normally (mn/mx/slice ~48 live vregs); 64 when the ragged
    # mask temporaries are in play, so the fold chain never spills.
    tr_limit = 64 if ragged else tr_cap
    tr = R if R <= tr_limit else tr_limit

    grid = (pl.cdiv(R, tr), pl.cdiv(K, tk))
    kernel = functools.partial(_minmax_kernel, k_total=K, tk=tk, ragged=ragged)

    cost = pl.CostEstimate(
        flops=2 * R * K,
        transcendentals=0,
        bytes_accessed=R * K * itemsize + 2 * R * itemsize,
    )

    min_out, max_out = pl.pallas_call(
        kernel,
        out_shape=(
            jax.ShapeDtypeStruct((R, 1), dtype),
            jax.ShapeDtypeStruct((R, 1), dtype),
        ),
        grid_spec=pltpu.PrefetchScalarGridSpec(
            num_scalar_prefetch=0,
            grid=grid,
            in_specs=[pl.BlockSpec((tr, tk), lambda i, k: (i, k))],
            out_specs=[
                pl.BlockSpec((tr, 1), lambda i, k: (i, 0)),
                pl.BlockSpec((tr, 1), lambda i, k: (i, 0)),
            ],
            scratch_shapes=[
                pltpu.VMEM((tr, _LANE), dtype),
                pltpu.VMEM((tr, _LANE), dtype),
            ],
        ),
        compiler_params=pltpu.CompilerParams(
            # Rows are independent (megacore-shardable on v7x); K is the
            # reduction axis and must stay sequential.
            dimension_semantics=("parallel", "arbitrary"),
            vmem_limit_bytes=vmem_limit,
        ),
        cost_estimate=cost,
    )(x2d)
    return min_out, max_out


def _fold_factor(R, K, *, tr_cap=128, tk_cap=4096):
    """Fold factor f (any divisor of K): view (R, K) as (R*f, K//f) so the
    sublane axis is occupied and the row grid can have >= 2 parallel blocks
    (v7x megacore).  The wrapper combines the f per-row partials (tiny)."""
    if K < 2 * _LANE:
        return 1
    max_rows = 8 * tr_cap
    best_f, best_key = 1, None
    f = 1
    while f <= K and R * f <= max_rows:
        if K % f == 0 and (K // f) >= _LANE:
            rows, cols = R * f, K // f
            key = (
                rows % 8 == 0,             # full sublane occupancy
                min(rows, 2 * tr_cap),     # enough rows for >=2 parallel blocks
                cols >= tk_cap,            # keep full-width DMA tiles
                cols % _LANE == 0,         # avoid ragged-tail masking
                -f,                        # tie-break: smaller fold
            )
            if best_key is None or key > best_key:
                best_key, best_f = key, f
        f += 1
    return best_f


class RangeTracker:
    """JAX/Pallas port of the PyTorch RangeTracker forward pass."""

    def __init__(self, q_level):
        assert q_level in ("L", "C")
        self.q_level = q_level
        # No learnable parameters in the base module.

    @functools.partial(jax.jit, static_argnums=0)
    def forward(self, x):
        # x: NCHW, float
        N, C, H, W = x.shape
        if self.q_level == "L":
            R, K = 1, N * C * H * W
        else:  # 'C': reduce over dims 3, 2, 1 with keepdim -> (N, 1, 1, 1)
            R, K = N, C * H * W

        tk_cap, _ = _hw_params()
        f = _fold_factor(R, K, tk_cap=tk_cap)
        x2d = x.reshape(R * f, K // f)       # free row-major reshape, no copy
        mn, mx = _rowwise_minmax(x2d)        # (R*f, 1) each
        if f > 1:
            mn = jnp.min(mn.reshape(R, f), axis=1, keepdims=True)
            mx = jnp.max(mx.reshape(R, f), axis=1, keepdims=True)

        if self.q_level == "L":
            min_val = mn.reshape(())         # scalar, like torch.min(input)
            max_val = mx.reshape(())
        else:
            min_val = mn.reshape(N, 1, 1, 1)
            max_val = mx.reshape(N, 1, 1, 1)

        # TODO(synk): base class calls self.update_range(min_val, max_val),
        # which is NotImplementedError; subclasses define the stateful update.
        return min_val, max_val

    def __call__(self, x):
        return self.forward(x)


if __name__ == "__main__":
    key = jax.random.PRNGKey(0)
    x = jax.random.normal(key, (2, 4, 16, 16), dtype=jnp.float32)

    # Layer-wise
    tracker_l = RangeTracker("L")
    mn_l, mx_l = tracker_l(x)
    jax.block_until_ready((mn_l, mx_l))
    assert mn_l.shape == () and mx_l.shape == ()
    assert jnp.allclose(mn_l, jnp.min(x)), (mn_l, jnp.min(x))
    assert jnp.allclose(mx_l, jnp.max(x)), (mx_l, jnp.max(x))

    # Channel-wise (keepdim reduction over dims 3, 2, 1)
    tracker_c = RangeTracker("C")
    mn_c, mx_c = tracker_c(x)
    jax.block_until_ready((mn_c, mx_c))
    ref_mn = jnp.min(x, axis=(1, 2, 3), keepdims=True)
    ref_mx = jnp.max(x, axis=(1, 2, 3), keepdims=True)
    assert mn_c.shape == (2, 1, 1, 1) and mx_c.shape == (2, 1, 1, 1)
    assert jnp.allclose(mn_c, ref_mn), (mn_c, ref_mn)
    assert jnp.allclose(mx_c, ref_mx), (mx_c, ref_mx)

    # Odd-sized input exercising the per-slice ragged-tail mask and the
    # reduced-row-tile (tr=64 cap) path.
    x2 = jax.random.normal(jax.random.PRNGKey(1), (3, 5, 7, 9), dtype=jnp.float32)
    mn2, mx2 = RangeTracker("C")(x2)
    jax.block_until_ready((mn2, mx2))
    assert jnp.allclose(mn2, jnp.min(x2, axis=(1, 2, 3), keepdims=True))
    assert jnp.allclose(mx2, jnp.max(x2, axis=(1, 2, 3), keepdims=True))
    mn3, mx3 = RangeTracker("L")(x2)
    jax.block_until_ready((mn3, mx3))
    assert jnp.allclose(mn3, jnp.min(x2)) and jnp.allclose(mx3, jnp.max(x2))

    print("KERNEL_OK")
</pallas_src>

<mosaic_0001>
module attributes {stable_mosaic.version = 11 : i64} {
  func.func @_minmax_kernel(%arg0: i32, %arg1: i32, %arg2: memref<16x128xf32, #tpu.memory_space<vmem>>, %arg3: memref<16x1xf32, #tpu.memory_space<vmem>>, %arg4: memref<16x1xf32, #tpu.memory_space<vmem>>, %arg5: memref<16x128xf32, #tpu.memory_space<vmem>>, %arg6: memref<16x128xf32, #tpu.memory_space<vmem>>) attributes {dimension_semantics = [#tpu.dimension_semantics<parallel>, #tpu.dimension_semantics<arbitrary>], iteration_bounds = array<i64: 1, 1>, scalar_prefetch = 0 : i64, scratch_operands = 2 : i64, tpu.core_type = #tpu.core_type<tc>, window_params = [{transform_indices = @transform_0, window_bounds = array<i64: 16, 128>}, {transform_indices = @transform_1, window_bounds = array<i64: 16, 1>}, {transform_indices = @transform_2, window_bounds = array<i64: 16, 1>}]} {
    %c0_i32 = arith.constant 0 : i32
    %0 = arith.cmpi eq, %arg1, %c0_i32 : i32
    %1 = arith.extui %0 : i1 to i32
    %cst = arith.constant 0x7F800000 : f32
    %cst_0 = arith.constant 0xFF800000 : f32
    %c0_i32_1 = arith.constant 0 : i32
    %2 = arith.cmpi ne, %1, %c0_i32_1 : i32
    scf.if %2 {
      %13 = vector.broadcast %cst : f32 to vector<16x128xf32>
      %c0_13 = arith.constant 0 : index
      %c0_14 = arith.constant 0 : index
      %14 = vector.load %arg5[%c0_13, %c0_14] : memref<16x128xf32, #tpu.memory_space<vmem>>, vector<16x128xf32>
      tpu.vector_store %arg5[%c0_13, %c0_14], %13 {strides = array<i32>} : memref<16x128xf32, #tpu.memory_space<vmem>>, vector<16x128xf32>,
      %15 = vector.broadcast %cst_0 : f32 to vector<16x128xf32>
      %c0_15 = arith.constant 0 : index
      %c0_16 = arith.constant 0 : index
      %16 = vector.load %arg6[%c0_15, %c0_16] : memref<16x128xf32, #tpu.memory_space<vmem>>, vector<16x128xf32>
      tpu.vector_store %arg6[%c0_15, %c0_16], %15 {strides = array<i32>} : memref<16x128xf32, #tpu.memory_space<vmem>>, vector<16x128xf32>,
    } else {
    }
    %c0 = arith.constant 0 : index
    %c0_2 = arith.constant 0 : index
    %3 = vector.load %arg2[%c0, %c0_2] : memref<16x128xf32, #tpu.memory_space<vmem>>, vector<16x128xf32>
    %c0_3 = arith.constant 0 : index
    %c0_4 = arith.constant 0 : index
    %4 = vector.load %arg5[%c0_3, %c0_4] : memref<16x128xf32, #tpu.memory_space<vmem>>, vector<16x128xf32>
    %5 = arith.minimumf %4, %3 : vector<16x128xf32>
    %c0_5 = arith.constant 0 : index
    %c0_6 = arith.constant 0 : index
    %6 = vector.load %arg5[%c0_5, %c0_6] : memref<16x128xf32, #tpu.memory_space<vmem>>, vector<16x128xf32>
    tpu.vector_store %arg5[%c0_5, %c0_6], %5 {strides = array<i32>} : memref<16x128xf32, #tpu.memory_space<vmem>>, vector<16x128xf32>,
    %c0_7 = arith.constant 0 : index
    %c0_8 = arith.constant 0 : index
    %7 = vector.load %arg6[%c0_7, %c0_8] : memref<16x128xf32, #tpu.memory_space<vmem>>, vector<16x128xf32>
    %8 = arith.maximumf %7, %3 : vector<16x128xf32>
    %c0_9 = arith.constant 0 : index
    %c0_10 = arith.constant 0 : index
    %9 = vector.load %arg6[%c0_9, %c0_10] : memref<16x128xf32, #tpu.memory_space<vmem>>, vector<16x128xf32>
    tpu.vector_store %arg6[%c0_9, %c0_10], %8 {strides = array<i32>} : memref<16x128xf32, #tpu.memory_space<vmem>>, vector<16x128xf32>,
    %c0_i32_11 = arith.constant 0 : i32
    %10 = arith.cmpi eq, %arg1, %c0_i32_11 : i32
    %11 = arith.extui %10 : i1 to i32
    %c0_i32_12 = arith.constant 0 : i32
    %12 = arith.cmpi ne, %11, %c0_i32_12 : i32
    scf.if %12 {
      %c0_13 = arith.constant 0 : index
      %c0_14 = arith.constant 0 : index
      %13 = vector.load %arg5[%c0_13, %c0_14] : memref<16x128xf32, #tpu.memory_space<vmem>>, vector<16x128xf32>
      %cst_15 = arith.constant dense<0x7F800000> : vector<16xf32>
      %14 = vector.multi_reduction <minimumf>, %13, %cst_15 [1] : vector<16x128xf32> to vector<16xf32>
      %15 = vector.shape_cast %14 : vector<16xf32> to vector<16x1xf32>
      %c0_16 = arith.constant 0 : index
      %c0_17 = arith.constant 0 : index
      %16 = vector.load %arg3[%c0_16, %c0_17] : memref<16x1xf32, #tpu.memory_space<vmem>>, vector<16x1xf32>
      tpu.vector_store %arg3[%c0_16, %c0_17], %15 {strides = array<i32>} : memref<16x1xf32, #tpu.memory_space<vmem>>, vector<16x1xf32>,
      %c0_18 = arith.constant 0 : index
      %c0_19 = arith.constant 0 : index
      %17 = vector.load %arg6[%c0_18, %c0_19] : memref<16x128xf32, #tpu.memory_space<vmem>>, vector<16x128xf32>
      %cst_20 = arith.constant dense<0xFF800000> : vector<16xf32>
      %18 = vector.multi_reduction <maximumf>, %17, %cst_20 [1] : vector<16x128xf32> to vector<16xf32>
      %19 = vector.shape_cast %18 : vector<16xf32> to vector<16x1xf32>
      %c0_21 = arith.constant 0 : index
      %c0_22 = arith.constant 0 : index
      %20 = vector.load %arg4[%c0_21, %c0_22] : memref<16x1xf32, #tpu.memory_space<vmem>>, vector<16x1xf32>
      tpu.vector_store %arg4[%c0_21, %c0_22], %19 {strides = array<i32>} : memref<16x1xf32, #tpu.memory_space<vmem>>, vector<16x1xf32>,
    } else {
    }
    return
  }
  func.func @transform_0(%arg0: i32, %arg1: i32) -> (i32, i32) {
    %c0_i32 = arith.constant 0 : i32
    return %arg0, %arg1 : i32, i32
  }
  func.func @transform_1(%arg0: i32, %arg1: i32) -> (i32, i32) {
    %c0_i32 = arith.constant 0 : i32
    %c0_i32_0 = arith.constant 0 : i32
    return %arg0, %c0_i32 : i32, i32
  }
  func.func @transform_2(%arg0: i32, %arg1: i32) -> (i32, i32) {
    %c0_i32 = arith.constant 0 : i32
    %c0_i32_0 = arith.constant 0 : i32
    return %arg0, %c0_i32 : i32, i32
  }
}

</mosaic_0001>

<bundles_post_ra>
// kernel: forward.1
= control target key start
LH: loop header
LB: loop body
LE: loop exit
PB: predicated region body
PF: predicated region fallthrough
CT: control target
= control target key end

     0   :  { %vm41_vm0 = vcmask 7168   ;;  %s93_s0 = inlined_call_operand.vmem [shape: f32[16,128], index: 0, kind: input, shape index: {}]   ;;  %s94_s2 = inlined_call_operand.vmem [shape: f32[16,1], index: 2, kind: output, shape index: {1}]   ;;  %s95_s1 = inlined_call_operand.vmem [shape: f32[16,1], index: 1, kind: output, shape index: {0}]  }
   0x1   :  { %v18_v0 = vld [vmem:[%s93_s0] sm:$0xff]  ;;  %v19_v1 = vld [vmem:[%s93_s0 + $0x8] sm:$0xff] }
   0x2   :  { %46 = vmax.xlane.f32.xlu1 %v18_v0  ;;  %37 = vmin.xlane.f32.xlu0 %v18_v0 }
   0x6   :  { %48 = vmax.xlane.f32.xlu1 %v19_v1  ;;  %39 = vmin.xlane.f32.xlu0 %v19_v1 }
  0x8f   :  { %v47_v2 = vpop.xlane.xlu1 %46  ;;  %v38_v3 = vpop.xlane.xlu0 %37 }
  0x90   :  { %50 = vst.msk [vmem:[%s94_s2] sm:$0xff] %vm41_vm0, %v47_v2  ;;  %42 = vst.msk [vmem:[%s95_s1] sm:$0xff] %vm41_vm0, %v38_v3 }
  0x93   :  { %v49_v4 = vpop.xlane.xlu1 %48  ;;  %v40_v5 = vpop.xlane.xlu0 %39 }
  0x94   :  { %51 = vst.msk [vmem:[%s94_s2 + $0x8] sm:$0xff] %vm41_vm0, %v49_v4  ;;  %43 = vst.msk [vmem:[%s95_s1 + $0x8] sm:$0xff] %vm41_vm0, %v40_v5 }

</bundles_post_ra>
